<compile_context>
chip_gen: v7x
topology: tpu7x:2x2x1
jax: 0.10.0
libtpu: 0.0.40
codegen_flags: <defaults>
</compile_context>

<pallas_src>
import functools

import numpy as np
import jax
import jax.numpy as jnp
from jax.experimental import pallas as pl
from jax.experimental.pallas import tpu as pltpu


# ----------------------------------------------------------------------------
# Pallas kernel (one batch tile, fully fused)
# ----------------------------------------------------------------------------
def _mlres_kernel(*refs, hlayers_n: int, identity_skip: bool):
    if identity_skip:
        (x_ref, w0_ref, b0_ref, wl_ref, scl_ref, sft_ref,
         fcw_ref, fcb_ref, o_ref) = refs
    else:
        (x_ref, w0_ref, b0_ref, wl_ref, sft_ref,
         fcw_ref, fcb_ref, o_ref) = refs
        scl_ref = None

    f32 = jnp.float32
    bf16 = jnp.bfloat16

    # linear0 (BN0 scale pre-folded into w0) -> +shift -> ReLU
    h = jnp.dot(x_ref[...], w0_ref[...], preferred_element_type=f32)
    h = jnp.maximum(h + b0_ref[...], 0.0)

    # Residual blocks (hlayers_n is small & static -> unrolled).
    for i in range(hlayers_n):
        skip = h
        if identity_skip:
            t = jnp.maximum(h * scl_ref[2 * i] + sft_ref[2 * i], 0.0)
            t = jnp.dot(t.astype(bf16), wl_ref[2 * i], preferred_element_type=f32)
            t = jnp.maximum(t * scl_ref[2 * i + 1] + sft_ref[2 * i + 1], 0.0)
            t = jnp.dot(t.astype(bf16), wl_ref[2 * i + 1], preferred_element_type=f32)
            h = skip + t
        else:
            # BN scales already folded into wl; only the shift add remains.
            t = jnp.dot(h.astype(bf16), wl_ref[2 * i], preferred_element_type=f32)
            t = jnp.maximum(t + sft_ref[2 * i], 0.0)
            t = jnp.dot(t.astype(bf16), wl_ref[2 * i + 1], preferred_element_type=f32)
            t = t + sft_ref[2 * i + 1]
            h = jnp.maximum(skip + t, 0.0)

    # fc + (bias + logit-adjuster offset), lane-padded unmasked store.
    logits = jnp.dot(h.astype(bf16), fcw_ref[...], preferred_element_type=f32)
    o_ref[...] = logits + fcb_ref[...]


# ----------------------------------------------------------------------------
# Wrapper
# ----------------------------------------------------------------------------
def mlres_forward(x, params, *, hlayers_n, identity_skip, batch_tile=512):
    """x: (B, ...) image batch. Returns (B, num_classes) float32 logits."""
    B = x.shape[0]
    IN = int(params["in_features"])
    INp, D = params["w0"].shape
    Cp = params["fcw"].shape[1]
    C = int(params["num_classes"])
    H2 = 2 * hlayers_n

    x_flat = x.reshape(B, -1).astype(jnp.float32)          # torch.flatten(x, 1)
    assert x_flat.shape[1] == IN
    if INp > IN:                                            # lane-pad K: 784 -> 896
        x_flat = jnp.pad(x_flat, ((0, 0), (0, INp - IN)))
    x_flat = x_flat.astype(jnp.bfloat16)                    # halve the dominant HBM read

    # Batch tiling: never fall back to a single whole-batch tile. Pad B up to a
    # multiple of the tile; prefer >= 2 grid steps so "parallel" can use both v7x TCs.
    if B >= 2 * batch_tile:
        bt = batch_tile
    elif B > 8:
        bt = max(8, int(np.ceil(B / 2 / 8)) * 8)
    else:
        bt = 8
    Bp = int(np.ceil(B / bt)) * bt
    if Bp > B:
        x_flat = jnp.pad(x_flat, ((0, Bp - B), (0, 0)))
    grid = (Bp // bt,)

    kernel = functools.partial(
        _mlres_kernel, hlayers_n=hlayers_n, identity_skip=identity_skip
    )

    # Invariant operands (weights / shifts / fc) use constant index_maps -> VMEM resident.
    const2 = lambda b: (0, 0)
    const3 = lambda b: (0, 0, 0)
    in_specs = [pl.BlockSpec((bt, INp), lambda b: (b, 0))]          # x tile
    operands = [x_flat]
    in_specs += [pl.BlockSpec((INp, D), const2)]                    # w0 (bf16, BN0-folded)
    operands += [params["w0"]]
    in_specs += [pl.BlockSpec((1, D), const2)]                      # BN0 shift
    operands += [params["b0"]]
    in_specs += [pl.BlockSpec((H2, D, D), const3)]                  # hidden weights (bf16)
    operands += [params["lin"]]
    if identity_skip:
        in_specs += [pl.BlockSpec((H2, 1, D), const3)]              # BN scales
        operands += [params["scl"]]
    in_specs += [pl.BlockSpec((H2, 1, D), const3)]                  # BN shifts
    operands += [params["sft"]]
    in_specs += [pl.BlockSpec((D, Cp), const2)]                     # fc weight (bf16, padded)
    operands += [params["fcw"]]
    in_specs += [pl.BlockSpec((1, Cp), const2)]                     # fc bias + adjuster
    operands += [params["fcb"]]

    flops = 2 * Bp * (INp * D + H2 * D * D + D * Cp)
    bytes_accessed = int(sum(int(np.prod(a.shape)) * a.dtype.itemsize for a in operands)
                         + Bp * Cp * 4)
    cost = pl.CostEstimate(flops=flops, transcendentals=0, bytes_accessed=bytes_accessed)

    out_padded = pl.pallas_call(
        kernel,
        out_shape=jax.ShapeDtypeStruct((Bp, Cp), jnp.float32),
        grid=grid,
        in_specs=in_specs,
        out_specs=pl.BlockSpec((bt, Cp), lambda b: (b, 0)),
        compiler_params=pltpu.CompilerParams(
            dimension_semantics=("parallel",),
            vmem_limit_bytes=32 << 20,
        ),
        cost_estimate=cost,
    )(*operands)

    return out_padded[:B, :C]


# ----------------------------------------------------------------------------
# Raw parameters (mirror the PyTorch module's tensors) + packing for the kernel
# ----------------------------------------------------------------------------
def init_mlres_raw_params(key, *, in_features=28 * 28, features_d=128, hlayers_n=2,
                          num_classes=10, tau=1.0, img_num_per_cls=None):
    H2 = 2 * hlayers_n
    n_keys = 8 + 5 * H2                      # enough for every draw below (no reuse)
    kit = iter(jax.random.split(key, n_keys))

    def linear_w(k, fan_in, fan_out):
        bound = 1.0 / np.sqrt(fan_in)
        # stored already transposed: (fan_in, fan_out) so forward is x @ W
        return jax.random.uniform(k, (fan_in, fan_out), jnp.float32, -bound, bound)

    def bn_params(d):
        g = 1.0 + 0.1 * jax.random.normal(next(kit), (d,), jnp.float32)
        b = 0.1 * jax.random.normal(next(kit), (d,), jnp.float32)
        m = 0.1 * jax.random.normal(next(kit), (d,), jnp.float32)
        v = jax.random.uniform(next(kit), (d,), jnp.float32, 0.5, 1.5)
        return g, b, m, v

    w0t = linear_w(next(kit), in_features, features_d)
    bn0 = bn_params(features_d)

    lin, bn_g, bn_b, bn_m, bn_v = [], [], [], [], []
    for _ in range(H2):
        lin.append(linear_w(next(kit), features_d, features_d))
        g, b, m, v = bn_params(features_d)
        bn_g.append(g); bn_b.append(b); bn_m.append(m); bn_v.append(v)

    fc_wt = linear_w(next(kit), features_d, num_classes)
    fc_b = jax.random.uniform(next(kit), (num_classes,), jnp.float32,
                              -1.0 / features_d, 1.0 / features_d)

    # LogitAdjuster buffers (eval mode, additive, not for_training): out = x - tau*log(pY)
    if img_num_per_cls is None:
        img_num_per_cls = [max(1, int(round(100 * (0.8 ** i)))) for i in range(num_classes)]
    counts = np.asarray(img_num_per_cls, dtype=np.float64)
    log_pY = np.log(counts / counts.sum()).astype(np.float32)
    adj = (-tau * jnp.asarray(log_pY)) if tau > 0 else jnp.zeros((num_classes,), jnp.float32)

    return dict(
        w0t=w0t, bn0=bn0, lin_wt=jnp.stack(lin),
        bn_gamma=jnp.stack(bn_g), bn_beta=jnp.stack(bn_b),
        bn_mean=jnp.stack(bn_m), bn_var=jnp.stack(bn_v),
        fc_wt=fc_wt, fc_b=fc_b, adj=adj,
    )


def pack_params(raw, *, identity_skip, eps=1e-5, lane_pad=128, in_pad=128):
    """Fold BN (and the logit adjuster) and cast matmul operands to bf16."""
    IN, D = raw["w0t"].shape
    C = raw["fc_wt"].shape[1]

    # BN0 scale always folds into w0 (linear0 has no bias and no ReLU before BN0).
    g0, be0, m0, v0 = raw["bn0"]
    s0 = g0 / jnp.sqrt(v0 + eps)
    sh0 = be0 - m0 * s0
    INp = int(np.ceil(IN / in_pad)) * in_pad
    w0 = raw["w0t"] * s0[None, :]
    w0p = jnp.zeros((INp, D), jnp.float32).at[:IN].set(w0).astype(jnp.bfloat16)

    # Hidden-layer BN -> scale/shift.
    s = raw["bn_gamma"] / jnp.sqrt(raw["bn_var"] + eps)           # (2H, D)
    sh = raw["bn_beta"] - raw["bn_mean"] * s                      # (2H, D)
    if identity_skip:
        lin = raw["lin_wt"].astype(jnp.bfloat16)                  # BN precedes ReLU+linear
        scl = s[:, None, :]
    else:
        lin = (raw["lin_wt"] * s[:, None, :]).astype(jnp.bfloat16)  # fold scale into W
        scl = None

    # fc + logit-adjuster offset folded into one lane-padded bias.
    Cp = int(np.ceil(C / lane_pad)) * lane_pad
    fcw = jnp.zeros((D, Cp), jnp.float32).at[:, :C].set(raw["fc_wt"]).astype(jnp.bfloat16)
    fcb = jnp.zeros((1, Cp), jnp.float32).at[0, :C].set(raw["fc_b"] + raw["adj"])

    params = dict(w0=w0p, b0=sh0[None, :], lin=lin, sft=sh[:, None, :],
                  fcw=fcw, fcb=fcb, num_classes=C, in_features=IN)
    if identity_skip:
        params["scl"] = scl
    return params


# ----------------------------------------------------------------------------
# Pure-JAX f32 reference (matches the PyTorch eval-mode forward exactly)
# ----------------------------------------------------------------------------
def _reference(x, raw, *, hlayers_n, identity_skip, eps=1e-5):
    xf = x.reshape(x.shape[0], -1).astype(jnp.float32)

    def bn(v, g, b, m, var):
        return (v - m[None, :]) / jnp.sqrt(var[None, :] + eps) * g[None, :] + b[None, :]

    g0, b0, m0, v0 = raw["bn0"]
    h = xf @ raw["w0t"]
    h = jnp.maximum(bn(h, g0, b0, m0, v0), 0.0)
    for i in range(hlayers_n):
        skip = h
        if identity_skip:
            t = jnp.maximum(bn(h, raw["bn_gamma"][2 * i], raw["bn_beta"][2 * i],
                               raw["bn_mean"][2 * i], raw["bn_var"][2 * i]), 0.0)
            t = t @ raw["lin_wt"][2 * i]
            t = jnp.maximum(bn(t, raw["bn_gamma"][2 * i + 1], raw["bn_beta"][2 * i + 1],
                               raw["bn_mean"][2 * i + 1], raw["bn_var"][2 * i + 1]), 0.0)
            t = t @ raw["lin_wt"][2 * i + 1]
            h = skip + t
        else:
            t = h @ raw["lin_wt"][2 * i]
            t = jnp.maximum(bn(t, raw["bn_gamma"][2 * i], raw["bn_beta"][2 * i],
                               raw["bn_mean"][2 * i], raw["bn_var"][2 * i]), 0.0)
            t = t @ raw["lin_wt"][2 * i + 1]
            t = bn(t, raw["bn_gamma"][2 * i + 1], raw["bn_beta"][2 * i + 1],
                   raw["bn_mean"][2 * i + 1], raw["bn_var"][2 * i + 1])
            h = jnp.maximum(skip + t, 0.0)
    return h @ raw["fc_wt"] + raw["fc_b"][None, :] + raw["adj"][None, :]


# TODO(synk): training-mode BatchNorm (batch-statistic computation + running-stat updates)
# and the outFeature / outAllFeatures / fineGrainedFeatures feature-list capture (plus the
# ETF / DRBalancer classifier variants, which the module itself asserts out) are not
# implemented; the kernel covers the eval-mode logits path.

if __name__ == "__main__":
    B = 8                  # small demo batch
    features_d = 128       # mlp_features_d (lane-dense)
    hlayers_n = 2          # mlp_hlayer_n (>= 1)
    num_classes = 10
    identity_skip = False
    tau = 1.0

    key = jax.random.PRNGKey(0)
    k_params, k_x = jax.random.split(key)

    raw = init_mlres_raw_params(
        k_params, in_features=28 * 28, features_d=features_d,
        hlayers_n=hlayers_n, num_classes=num_classes, tau=tau,
    )
    params = pack_params(raw, identity_skip=identity_skip)

    x = jax.random.normal(k_x, (B, 1, 28, 28), dtype=jnp.float32)

    out = mlres_forward(
        x, params, hlayers_n=hlayers_n, identity_skip=identity_skip, batch_tile=512
    )
    out = jax.block_until_ready(out)

    ref = jax.block_until_ready(
        _reference(x, raw, hlayers_n=hlayers_n, identity_skip=identity_skip)
    )

    assert out.shape == (B, num_classes) and out.dtype == jnp.float32
    # bf16 MXU operands (f32 accumulation) vs f32 reference -> loosened tolerance.
    np.testing.assert_allclose(np.asarray(out), np.asarray(ref), rtol=5e-2, atol=5e-2)

    print("KERNEL_OK")
</pallas_src>

<mosaic_0001>
module attributes {stable_mosaic.version = 11 : i64} {
  func.func @_mlres_kernel(%arg0: i32, %arg1: memref<8x896xbf16, #tpu.memory_space<vmem>>, %arg2: memref<896x128xbf16, #tpu.memory_space<vmem>>, %arg3: memref<1x128xf32, #tpu.memory_space<vmem>>, %arg4: memref<4x128x128xbf16, #tpu.memory_space<vmem>>, %arg5: memref<4x1x128xf32, #tpu.memory_space<vmem>>, %arg6: memref<128x128xbf16, #tpu.memory_space<vmem>>, %arg7: memref<1x128xf32, #tpu.memory_space<vmem>>, %arg8: memref<8x128xf32, #tpu.memory_space<vmem>>) attributes {dimension_semantics = [#tpu.dimension_semantics<parallel>], iteration_bounds = array<i64: 1>, scalar_prefetch = 0 : i64, scratch_operands = 0 : i64, tpu.core_type = #tpu.core_type<tc>, window_params = [{transform_indices = @transform_0, window_bounds = array<i64: 8, 896>}, {pipeline_mode = #tpu.pipeline_mode<synchronous>, transform_indices = @transform_1, window_bounds = array<i64: 896, 128>}, {pipeline_mode = #tpu.pipeline_mode<synchronous>, transform_indices = @transform_2, window_bounds = array<i64: 1, 128>}, {pipeline_mode = #tpu.pipeline_mode<synchronous>, transform_indices = @transform_3, window_bounds = array<i64: 4, 128, 128>}, {pipeline_mode = #tpu.pipeline_mode<synchronous>, transform_indices = @transform_4, window_bounds = array<i64: 4, 1, 128>}, {pipeline_mode = #tpu.pipeline_mode<synchronous>, transform_indices = @transform_5, window_bounds = array<i64: 128, 128>}, {pipeline_mode = #tpu.pipeline_mode<synchronous>, transform_indices = @transform_6, window_bounds = array<i64: 1, 128>}, {transform_indices = @transform_7, window_bounds = array<i64: 8, 128>}]} {
    %c0 = arith.constant 0 : index
    %c0_0 = arith.constant 0 : index
    %0 = vector.load %arg1[%c0, %c0_0] : memref<8x896xbf16, #tpu.memory_space<vmem>>, vector<8x896xbf16>
    %c0_1 = arith.constant 0 : index
    %c0_2 = arith.constant 0 : index
    %1 = vector.load %arg2[%c0_1, %c0_2] : memref<896x128xbf16, #tpu.memory_space<vmem>>, vector<896x128xbf16>
    %cst = arith.constant dense<0.000000e+00> : vector<8x128xf32>
    %2 = tpu.matmul %0, %1, %cst {dimension_numbers = #tpu.dot_dimension_numbers<[1], [0], [0], [1], [0, 0, 1, 1], [], []>} : vector<8x896xbf16>, vector<896x128xbf16>, vector<8x128xf32> -> vector<8x128xf32>
    %c0_3 = arith.constant 0 : index
    %c0_4 = arith.constant 0 : index
    %3 = vector.load %arg3[%c0_3, %c0_4] : memref<1x128xf32, #tpu.memory_space<vmem>>, vector<1x128xf32>
    %4 = vector.broadcast %3 : vector<1x128xf32> to vector<8x128xf32>
    %5 = arith.addf %2, %4 : vector<8x128xf32>
    %cst_5 = arith.constant 0.000000e+00 : f32
    %6 = vector.broadcast %cst_5 : f32 to vector<8x128xf32>
    %7 = arith.maximumf %5, %6 : vector<8x128xf32>
    %8 = arith.truncf %7 : vector<8x128xf32> to vector<8x128xbf16>
    %c0_6 = arith.constant 0 : index
    %c0_7 = arith.constant 0 : index
    %c0_8 = arith.constant 0 : index
    %9 = vector.load %arg4[%c0_6, %c0_7, %c0_8] : memref<4x128x128xbf16, #tpu.memory_space<vmem>>, vector<1x128x128xbf16>
    %10 = vector.shape_cast %9 : vector<1x128x128xbf16> to vector<128x128xbf16>
    %cst_9 = arith.constant dense<0.000000e+00> : vector<8x128xf32>
    %11 = tpu.matmul %8, %10, %cst_9 {dimension_numbers = #tpu.dot_dimension_numbers<[1], [0], [0], [1], [0, 0, 1, 1], [], []>} : vector<8x128xbf16>, vector<128x128xbf16>, vector<8x128xf32> -> vector<8x128xf32>
    %c0_10 = arith.constant 0 : index
    %c0_11 = arith.constant 0 : index
    %c0_12 = arith.constant 0 : index
    %12 = vector.load %arg5[%c0_10, %c0_11, %c0_12] : memref<4x1x128xf32, #tpu.memory_space<vmem>>, vector<1x1x128xf32>
    %13 = vector.shape_cast %12 : vector<1x1x128xf32> to vector<1x128xf32>
    %14 = vector.broadcast %13 : vector<1x128xf32> to vector<8x128xf32>
    %15 = arith.addf %11, %14 : vector<8x128xf32>
    %cst_13 = arith.constant 0.000000e+00 : f32
    %16 = vector.broadcast %cst_13 : f32 to vector<8x128xf32>
    %17 = arith.maximumf %15, %16 : vector<8x128xf32>
    %18 = arith.truncf %17 : vector<8x128xf32> to vector<8x128xbf16>
    %c1 = arith.constant 1 : index
    %c0_14 = arith.constant 0 : index
    %c0_15 = arith.constant 0 : index
    %19 = vector.load %arg4[%c1, %c0_14, %c0_15] : memref<4x128x128xbf16, #tpu.memory_space<vmem>>, vector<1x128x128xbf16>
    %20 = vector.shape_cast %19 : vector<1x128x128xbf16> to vector<128x128xbf16>
    %cst_16 = arith.constant dense<0.000000e+00> : vector<8x128xf32>
    %21 = tpu.matmul %18, %20, %cst_16 {dimension_numbers = #tpu.dot_dimension_numbers<[1], [0], [0], [1], [0, 0, 1, 1], [], []>} : vector<8x128xbf16>, vector<128x128xbf16>, vector<8x128xf32> -> vector<8x128xf32>
    %c1_17 = arith.constant 1 : index
    %c0_18 = arith.constant 0 : index
    %c0_19 = arith.constant 0 : index
    %22 = vector.load %arg5[%c1_17, %c0_18, %c0_19] : memref<4x1x128xf32, #tpu.memory_space<vmem>>, vector<1x1x128xf32>
    %23 = vector.shape_cast %22 : vector<1x1x128xf32> to vector<1x128xf32>
    %24 = vector.broadcast %23 : vector<1x128xf32> to vector<8x128xf32>
    %25 = arith.addf %21, %24 : vector<8x128xf32>
    %26 = arith.addf %7, %25 : vector<8x128xf32>
    %cst_20 = arith.constant 0.000000e+00 : f32
    %27 = vector.broadcast %cst_20 : f32 to vector<8x128xf32>
    %28 = arith.maximumf %26, %27 : vector<8x128xf32>
    %29 = arith.truncf %28 : vector<8x128xf32> to vector<8x128xbf16>
    %c2 = arith.constant 2 : index
    %c0_21 = arith.constant 0 : index
    %c0_22 = arith.constant 0 : index
    %30 = vector.load %arg4[%c2, %c0_21, %c0_22] : memref<4x128x128xbf16, #tpu.memory_space<vmem>>, vector<1x128x128xbf16>
    %31 = vector.shape_cast %30 : vector<1x128x128xbf16> to vector<128x128xbf16>
    %cst_23 = arith.constant dense<0.000000e+00> : vector<8x128xf32>
    %32 = tpu.matmul %29, %31, %cst_23 {dimension_numbers = #tpu.dot_dimension_numbers<[1], [0], [0], [1], [0, 0, 1, 1], [], []>} : vector<8x128xbf16>, vector<128x128xbf16>, vector<8x128xf32> -> vector<8x128xf32>
    %c2_24 = arith.constant 2 : index
    %c0_25 = arith.constant 0 : index
    %c0_26 = arith.constant 0 : index
    %33 = vector.load %arg5[%c2_24, %c0_25, %c0_26] : memref<4x1x128xf32, #tpu.memory_space<vmem>>, vector<1x1x128xf32>
    %34 = vector.shape_cast %33 : vector<1x1x128xf32> to vector<1x128xf32>
    %35 = vector.broadcast %34 : vector<1x128xf32> to vector<8x128xf32>
    %36 = arith.addf %32, %35 : vector<8x128xf32>
    %cst_27 = arith.constant 0.000000e+00 : f32
    %37 = vector.broadcast %cst_27 : f32 to vector<8x128xf32>
    %38 = arith.maximumf %36, %37 : vector<8x128xf32>
    %39 = arith.truncf %38 : vector<8x128xf32> to vector<8x128xbf16>
    %c3 = arith.constant 3 : index
    %c0_28 = arith.constant 0 : index
    %c0_29 = arith.constant 0 : index
    %40 = vector.load %arg4[%c3, %c0_28, %c0_29] : memref<4x128x128xbf16, #tpu.memory_space<vmem>>, vector<1x128x128xbf16>
    %41 = vector.shape_cast %40 : vector<1x128x128xbf16> to vector<128x128xbf16>
    %cst_30 = arith.constant dense<0.000000e+00> : vector<8x128xf32>
    %42 = tpu.matmul %39, %41, %cst_30 {dimension_numbers = #tpu.dot_dimension_numbers<[1], [0], [0], [1], [0, 0, 1, 1], [], []>} : vector<8x128xbf16>, vector<128x128xbf16>, vector<8x128xf32> -> vector<8x128xf32>
    %c3_31 = arith.constant 3 : index
    %c0_32 = arith.constant 0 : index
    %c0_33 = arith.constant 0 : index
    %43 = vector.load %arg5[%c3_31, %c0_32, %c0_33] : memref<4x1x128xf32, #tpu.memory_space<vmem>>, vector<1x1x128xf32>
    %44 = vector.shape_cast %43 : vector<1x1x128xf32> to vector<1x128xf32>
    %45 = vector.broadcast %44 : vector<1x128xf32> to vector<8x128xf32>
    %46 = arith.addf %42, %45 : vector<8x128xf32>
    %47 = arith.addf %28, %46 : vector<8x128xf32>
    %cst_34 = arith.constant 0.000000e+00 : f32
    %48 = vector.broadcast %cst_34 : f32 to vector<8x128xf32>
    %49 = arith.maximumf %47, %48 : vector<8x128xf32>
    %50 = arith.truncf %49 : vector<8x128xf32> to vector<8x128xbf16>
    %c0_35 = arith.constant 0 : index
    %c0_36 = arith.constant 0 : index
    %51 = vector.load %arg6[%c0_35, %c0_36] : memref<128x128xbf16, #tpu.memory_space<vmem>>, vector<128x128xbf16>
    %cst_37 = arith.constant dense<0.000000e+00> : vector<8x128xf32>
    %52 = tpu.matmul %50, %51, %cst_37 {dimension_numbers = #tpu.dot_dimension_numbers<[1], [0], [0], [1], [0, 0, 1, 1], [], []>} : vector<8x128xbf16>, vector<128x128xbf16>, vector<8x128xf32> -> vector<8x128xf32>
    %c0_38 = arith.constant 0 : index
    %c0_39 = arith.constant 0 : index
    %53 = vector.load %arg7[%c0_38, %c0_39] : memref<1x128xf32, #tpu.memory_space<vmem>>, vector<1x128xf32>
    %54 = vector.broadcast %53 : vector<1x128xf32> to vector<8x128xf32>
    %55 = arith.addf %52, %54 : vector<8x128xf32>
    %c0_40 = arith.constant 0 : index
    %c0_41 = arith.constant 0 : index
    %56 = vector.load %arg8[%c0_40, %c0_41] : memref<8x128xf32, #tpu.memory_space<vmem>>, vector<8x128xf32>
    tpu.vector_store %arg8[%c0_40, %c0_41], %55 {strides = array<i32>} : memref<8x128xf32, #tpu.memory_space<vmem>>, vector<8x128xf32>,
    return
  }
  func.func @transform_0(%arg0: i32) -> (i32, i32) {
    %c0_i32 = arith.constant 0 : i32
    %c0_i32_0 = arith.constant 0 : i32
    return %arg0, %c0_i32 : i32, i32
  }
  func.func @transform_1(%arg0: i32) -> (i32, i32) {
    %c0_i32 = arith.constant 0 : i32
    %c0_i32_0 = arith.constant 0 : i32
    %c0_i32_1 = arith.constant 0 : i32
    return %c0_i32, %c0_i32_0 : i32, i32
  }
  func.func @transform_2(%arg0: i32) -> (i32, i32) {
    %c0_i32 = arith.constant 0 : i32
    %c0_i32_0 = arith.constant 0 : i32
    %c0_i32_1 = arith.constant 0 : i32
    return %c0_i32, %c0_i32_0 : i32, i32
  }
  func.func @transform_3(%arg0: i32) -> (i32, i32, i32) {
    %c0_i32 = arith.constant 0 : i32
    %c0_i32_0 = arith.constant 0 : i32
    %c0_i32_1 = arith.constant 0 : i32
    %c0_i32_2 = arith.constant 0 : i32
    return %c0_i32, %c0_i32_0, %c0_i32_1 : i32, i32, i32
  }
  func.func @transform_4(%arg0: i32) -> (i32, i32, i32) {
    %c0_i32 = arith.constant 0 : i32
    %c0_i32_0 = arith.constant 0 : i32
    %c0_i32_1 = arith.constant 0 : i32
    %c0_i32_2 = arith.constant 0 : i32
    return %c0_i32, %c0_i32_0, %c0_i32_1 : i32, i32, i32
  }
  func.func @transform_5(%arg0: i32) -> (i32, i32) {
    %c0_i32 = arith.constant 0 : i32
    %c0_i32_0 = arith.constant 0 : i32
    %c0_i32_1 = arith.constant 0 : i32
    return %c0_i32, %c0_i32_0 : i32, i32
  }
  func.func @transform_6(%arg0: i32) -> (i32, i32) {
    %c0_i32 = arith.constant 0 : i32
    %c0_i32_0 = arith.constant 0 : i32
    %c0_i32_1 = arith.constant 0 : i32
    return %c0_i32, %c0_i32_0 : i32, i32
  }
  func.func @transform_7(%arg0: i32) -> (i32, i32) {
    %c0_i32 = arith.constant 0 : i32
    %c0_i32_0 = arith.constant 0 : i32
    return %arg0, %c0_i32 : i32, i32
  }
}

</mosaic_0001>

<bundles_post_ra>
// kernel: tpu_custom_call.1
= control target key start
LH: loop header
LB: loop body
LE: loop exit
PB: predicated region body
PF: predicated region fallthrough
CT: control target
= control target key end

     0   :  { %12 = vsyncpa [#allocation3], 0  ;;  %s2099_s0 = inlined_call_operand.hbm [shape: bf16[8,896], index: 0, kind: input, shape index: {}]   ;;  %s2100_s1 = inlined_call_operand.hbm [shape: bf16[896,128], index: 1, kind: input, shape index: {}]   ;;  %s2101_s2 = inlined_call_operand.vmem [shape: f32[1,128], index: 2, kind: input, shape index: {}]   ;;  %s2102_s3 = inlined_call_operand.hbm [shape: bf16[4,128,128], index: 3, kind: input, shape index: {}]   ;;  %s2103_s4 = inlined_call_operand.vmem [shape: f32[4,1,128], index: 4, kind: input, shape index: {}]   ;;  %s2104_s5 = inlined_call_operand.hbm [shape: bf16[128,128], index: 5, kind: input, shape index: {}]   ;;  %s2105_s6 = inlined_call_operand.vmem [shape: f32[1,128], index: 6, kind: input, shape index: {}]   ;;  %s2106_s7 = inlined_call_operand.hbm [shape: f32[8,128], index: 7, kind: output, shape index: {}]  }
   0x1   :  { %13 = vsyncpa [#allocation6], 0 }
   0x2   :  { %14 = vsyncpa [#allocation9], 0 }
   0x3   :  { %15 = vsyncpa [#allocation4], 0  ;;  %s1898_s24 = smov [#allocation5]   ;;  %s1780_s28 = scalar_lea.hbm %s2100_s1, 7168 }
   0x4   :  { %s31_s25 = sshll.u32 %s1898_s24, 4  ;;  %p1781_p0 = scmp.ne.s32.totalorder %s2100_s1, %s1780_s28  ;;  %s32_s25 = int_to_ptr.vmem [resolvable:$true] %s31_s25 }
   0x5   :  { %p1784_p1 = scmp.lt.u32.totalorder %s1780_s28, %s2100_s1 }
   0x7   :  { %p1786_p2 = pnand %p1784_p1, %p1781_p0 }
   0x9   :  { %1789 = shalt.err (!%p1786_p2)
}
   0xa   :  { %s1790_s10 = scalar_lea.vmem %s32_s25, 7168  ;;  %p1795_p4 = scmp.lt.s32.totalorder %s32_s25, %s32_s25 }
   0xb   :  { %p1791_p3 = scmp.ne.s32.totalorder %s32_s25, %s1790_s10  ;;  %p1796_p5 = scmp.lt.s32.totalorder %s1790_s10, %s1790_s10 }
   0xd   :  { %p1797_p6 = por %p1796_p5, %p1795_p4 }
   0xf   :  { %p1798_p7 = pnand %p1797_p6, %p1791_p3 }
  0x11   :  { %1801 = shalt.err (!%p1798_p7)
}
  0x12   :  { %s1899_s11 = smov 64   ;;  %s1900_s12 = smov 4  }
  0x13   :  { %37 = dma.hbm_to_vmem [thread:$0]  %s2100_s1, 7168, %s32_s25, [#allocation6], %s1899_s11, %s1899_s11, %s1900_s12  }
  0x14   :  { %s1901_s15 = smov [#allocation2]   ;;  %s1902_s17 = smov [#allocation7]  }
  0x15   :  { %s22_s16 = sshll.u32 %s1901_s15, 4  ;;  %s45_s18 = sshll.u32 %s1902_s17, 4  ;;  %s23_s16 = int_to_ptr.vmem [resolvable:$true] %s22_s16  ;;  %s46_s18 = int_to_ptr.vmem [resolvable:$true] %s45_s18 }
  0x16   :  { %s1802_s21 = scalar_lea.hbm %s2099_s0, 448 }
  0x17   :  { %p1803_p8 = scmp.ne.s32.totalorder %s2099_s0, %s1802_s21  ;;  %p1806_p9 = scmp.lt.u32.totalorder %s1802_s21, %s2099_s0 }
  0x19   :  { %p1808_p10 = pnand %p1806_p9, %p1803_p8 }
  0x1b   :  { %1811 = shalt.err (!%p1808_p10)
}
  0x1c   :  { %s1812_s1 = scalar_lea.vmem %s23_s16, 448  ;;  %p1817_p12 = scmp.lt.s32.totalorder %s23_s16, %s23_s16 }
  0x1d   :  { %p1813_p11 = scmp.ne.s32.totalorder %s23_s16, %s1812_s1  ;;  %p1818_p13 = scmp.lt.s32.totalorder %s1812_s1, %s1812_s1 }
  0x1f   :  { %p1819_p0 = por %p1818_p13, %p1817_p12 }
  0x21   :  { %p1820_p1 = pnand %p1819_p0, %p1813_p11 }
  0x23   :  { %1823 = shalt.err (!%p1820_p1)
}
  0x24   :  { %25 = dma.hbm_to_vmem [thread:$0]  %s2099_s0, 448, %s23_s16, [#allocation3]  }
  0x25   :  { %s1824_s30 = scalar_lea.hbm %s2102_s3, 4096 }
  0x26   :  { %p1825_p2 = scmp.ne.s32.totalorder %s2102_s3, %s1824_s30  ;;  %p1828_p3 = scmp.lt.u32.totalorder %s1824_s30, %s2102_s3 }
  0x28   :  { %p1830_p4 = pnand %p1828_p3, %p1825_p2 }
  0x2a   :  { %1833 = shalt.err (!%p1830_p4)
}
  0x2b   :  { %s1834_s14 = scalar_lea.vmem %s46_s18, 4096  ;;  %p1839_p6 = scmp.lt.s32.totalorder %s46_s18, %s46_s18 }
  0x2c   :  { %p1835_p5 = scmp.ne.s32.totalorder %s46_s18, %s1834_s14  ;;  %p1840_p7 = scmp.lt.s32.totalorder %s1834_s14, %s1834_s14 }
  0x2e   :  { %p1841_p8 = por %p1840_p7, %p1839_p6 }
  0x30   :  { %p1842_p9 = pnand %p1841_p8, %p1835_p5 }
  0x32   :  { %1845 = shalt.err (!%p1842_p9)
}
  0x33   :  { %51 = dma.hbm_to_vmem [thread:$0]  %s2102_s3, 4096, %s46_s18, [#allocation6], %s1899_s11, %s1899_s11, %s1900_s12  }
  0x34   :  { %s1903_s16 = smov [#allocation8]   ;;  %s1846_s21 = scalar_lea.hbm %s2104_s5, 1024 }
  0x35   :  { %s59_s17 = sshll.u32 %s1903_s16, 4  ;;  %p1847_p10 = scmp.ne.s32.totalorder %s2104_s5, %s1846_s21  ;;  %s60_s17 = int_to_ptr.vmem [resolvable:$true] %s59_s17 }
  0x36   :  { %p1850_p11 = scmp.lt.u32.totalorder %s1846_s21, %s2104_s5 }
  0x38   :  { %p1852_p12 = pnand %p1850_p11, %p1847_p10 }
  0x3a   :  { %1855 = shalt.err (!%p1852_p12)
}
  0x3b   :  { %s1856_s1 = scalar_lea.vmem %s60_s17, 1024  ;;  %p1861_p0 = scmp.lt.s32.totalorder %s60_s17, %s60_s17 }
  0x3c   :  { %p1857_p13 = scmp.ne.s32.totalorder %s60_s17, %s1856_s1  ;;  %p1862_p1 = scmp.lt.s32.totalorder %s1856_s1, %s1856_s1 }
  0x3e   :  { %p1863_p2 = por %p1862_p1, %p1861_p0 }
  0x40   :  { %p1864_p3 = pnand %p1863_p2, %p1857_p13 }
  0x42   :  { %1867 = shalt.err (!%p1864_p3)
}
  0x43   :  { %65 = dma.hbm_to_vmem [thread:$0]  %s2104_s5, 1024, %s60_s17, [#allocation9], %s1899_s11, %s1899_s11, %s1900_s12  }
  0x44   :  { %1890 = dma.done.wait [#allocation3], 448  }
  0x45   :  { %1891 = vsyncadd [#allocation3], 4294966848 }
  0x46   :  { %1892 = dma.done.wait [#allocation6], 11264  }
  0x47   :  { %1893 = vsyncadd [#allocation6], 4294956032 }
  0x48   :  { %1894 = dma.done.wait [#allocation9], 1024  }
  0x49   :  { %1895 = vsyncadd [#allocation9], 4294966272  ;;  %v1677_v0 = vld [vmem:[#allocation5 + $0x40] sm:$0xff]   ;;  %v1681_v4 = vld [vmem:[#allocation5 + $0x48] sm:$0xff]   ;;  %v1904_v42 = vmov 0.0   ;;  %vm1905_vm0 = vmmov 0  }
  0x4a   :  { %v1678_v1 = vld [vmem:[#allocation5] sm:$0xff]   ;;  %1428 = vmatprep.subr.bf16.mxu0 %v1677_v0  ;;  %v1682_v5 = vld [vmem:[#allocation5 + $0x8] sm:$0xff]   ;;  %v1685_v8 = vld [vmem:[#allocation5 + $0x50] sm:$0xff]   ;;  %s1906_s13 = smov [#allocation10]  }
  0x4b   :  { %v1679_v2 = vld [vmem:[#allocation5 + $0xc0] sm:$0xff]   ;;  %1429 = vmatpush3.bf16.msra.mxu0 %v1678_v1  ;;  %v1683_v6 = vld [vmem:[#allocation5 + $0xc8] sm:$0xff]   ;;  %v1686_v9 = vld [vmem:[#allocation5 + $0x10] sm:$0xff]   ;;  %s1305_s14 = sshll.u32 %s1906_s13, 4  ;;  %s1306_s14 = int_to_ptr.vmem [resolvable:$true] %s1305_s14 }
  0x4c   :  { %v1680_v3 = vld [vmem:[#allocation5 + $0x80] sm:$0xff]   ;;  %1450 = vmatprep.subr.bf16.mxu1 %v1679_v2  ;;  %1430 = vmatprep.subr.bf16.mxu0 %v1681_v4  ;;  %v1684_v7 = vld [vmem:[#allocation5 + $0x88] sm:$0xff]   ;;  %v1687_v10 = vld [vmem:[#allocation5 + $0xd0] sm:$0xff]   ;;  %p1873_p5 = scmp.lt.s32.totalorder %s1306_s14, %s1306_s14 }
  0x4d   :  { %1451 = vmatpush3.bf16.msra.mxu1 %v1680_v3  ;;  %v1688_v11 = vld [vmem:[#allocation5 + $0x90] sm:$0xff]   ;;  %v1689_v12 = vld [vmem:[#allocation5 + $0x58] sm:$0xff]   ;;  %v1693_v16 = vld [vmem:[#allocation5 + $0x60] sm:$0xff]  }
  0x4e   :  { %1452 = vmatprep.subr.bf16.mxu1 %v1683_v6  ;;  %v1690_v13 = vld [vmem:[#allocation5 + $0x18] sm:$0xff]   ;;  %v1694_v17 = vld [vmem:[#allocation5 + $0x20] sm:$0xff]   ;;  %v1697_v20 = vld [vmem:[#allocation5 + $0x68] sm:$0xff]  }
  0x4f   :  { %1431 = vmatpush3.bf16.msra.mxu0 %v1682_v5  ;;  %v1691_v14 = vld [vmem:[#allocation5 + $0xd8] sm:$0xff]   ;;  %v1695_v18 = vld [vmem:[#allocation5 + $0xe0] sm:$0xff]   ;;  %v1698_v21 = vld [vmem:[#allocation5 + $0x28] sm:$0xff]  }
  0x50   :  { %1432 = vmatprep.subr.bf16.mxu0 %v1685_v8  ;;  %v1692_v15 = vld [vmem:[#allocation5 + $0x98] sm:$0xff]   ;;  %v1696_v19 = vld [vmem:[#allocation5 + $0xa0] sm:$0xff]   ;;  %v1699_v22 = vld [vmem:[#allocation5 + $0xe8] sm:$0xff]  }
  0x51   :  { %1453 = vmatpush3.bf16.msra.mxu1 %v1684_v7  ;;  %v1700_v23 = vld [vmem:[#allocation5 + $0xa8] sm:$0xff]   ;;  %v1701_v24 = vld [vmem:[#allocation5 + $0x70] sm:$0xff]   ;;  %v1705_v28 = vld [vmem:[#allocation5 + $0x78] sm:$0xff]  }
  0x52   :  { %1454 = vmatprep.subr.bf16.mxu1 %v1687_v10  ;;  %v1702_v25 = vld [vmem:[#allocation5 + $0x30] sm:$0xff]   ;;  %v1706_v29 = vld [vmem:[#allocation5 + $0x38] sm:$0xff]   ;;  %v81_v31 = vld [vmem:[#allocation2] sm:$0xff] }
  0x53   :  { %1433 = vmatpush3.bf16.msra.mxu0 %v1686_v9  ;;  %v1703_v26 = vld [vmem:[#allocation5 + $0xf0] sm:$0xff]   ;;  %v1707_v30 = vld [vmem:[#allocation5 + $0xf8] sm:$0xff]   ;;  %v1317_v32 = vcombine.low %v81_v31, %v81_v31  ;;  %v1318_v33 = vcombine.high %v81_v31, %v81_v31  ;;  %v1711_v35 = vld [vmem:[#allocation5 + $0x140] sm:$0xff]  }
  0x54   :  { %1434 = vmatprep.subr.bf16.mxu0 %v1689_v12  ;;  %v1704_v27 = vld [vmem:[#allocation5 + $0xb0] sm:$0xff]   ;;  %v1710_v34 = vld [vmem:[#allocation5 + $0xb8] sm:$0xff]   ;;  %v1714_v39 = vld [vmem:[#allocation5 + $0x100] sm:$0xff]  }
  0x55   :  { %1455 = vmatpush3.bf16.msra.mxu1 %v1688_v11  ;;  %v82_v36 = vld [vmem:[#allocation2 + $0x8] sm:$0xff]  ;;  %597 = vmatprep.mubr.bf16.mxu0 %v1318_v33  ;;  %v1715_v40 = vld [vmem:[#allocation5 + $0x180] sm:$0xff]   ;;  %v1722_v48 = vld [vmem:[#allocation5 + $0x158] sm:$0xff]  }
  0x56   :  { %1456 = vmatprep.subr.bf16.mxu1 %v1691_v14  ;;  %v1319_v37 = vcombine.low %v82_v36, %v82_v36  ;;  %v1320_v38 = vcombine.high %v82_v36, %v82_v36  ;;  %v1716_v41 = vld [vmem:[#allocation5 + $0x148] sm:$0xff]   ;;  %v1719_v45 = vld [vmem:[#allocation5 + $0x150] sm:$0xff]   ;;  %v1723_v49 = vld [vmem:[#allocation5 + $0x118] sm:$0xff]  }
  0x57   :  { %1435 = vmatpush3.bf16.msra.mxu0 %v1690_v13  ;;  %v1717_v43 = vld [vmem:[#allocation5 + $0x108] sm:$0xff]   ;;  %v1720_v46 = vld [vmem:[#allocation5 + $0x110] sm:$0xff]   ;;  %v1725_v50 = vld [vmem:[#allocation5 + $0x160] sm:$0xff]  }
  0x58   :  { %1436 = vmatprep.subr.bf16.mxu0 %v1693_v16  ;;  %637 = vmatprep.mubr.bf16.mxu1 %v1320_v38  ;;  %v1718_v44 = vld [vmem:[#allocation5 + $0x188] sm:$0xff]   ;;  %v1721_v47 = vld [vmem:[#allocation5 + $0x190] sm:$0xff]   ;;  %v1724_v51 = vld [vmem:[#allocation5 + $0x198] sm:$0xff]  }
  0x59   :  { %1457 = vmatpush3.bf16.msra.mxu1 %v1692_v15  ;;  %v1726_v52 = vld [vmem:[#allocation5 + $0x120] sm:$0xff]   ;;  %v1728_v53 = vld [vmem:[#allocation5 + $0x168] sm:$0xff]   ;;  %v1731_v56 = vld [vmem:[#allocation5 + $0x170] sm:$0xff]  }
  0x5a   :  { %1458 = vmatprep.subr.bf16.mxu1 %v1695_v18  ;;  %v1727_v54 = vld [vmem:[#allocation5 + $0x1a0] sm:$0xff]   ;;  %v1729_v55 = vld [vmem:[#allocation5 + $0x128] sm:$0xff]   ;;  %v1732_v58 = vld [vmem:[#allocation5 + $0x130] sm:$0xff]  }
  0x5b   :  { %1437 = vmatpush3.bf16.msra.mxu0 %v1694_v17  ;;  %v1730_v57 = vld [vmem:[#allocation5 + $0x1a8] sm:$0xff]   ;;  %v83_v59 = vld [vmem:[#allocation2 + $0x10] sm:$0xff]  ;;  %v1739_v2 = vld [vmem:[#allocation2 + $0x18] ss:$0 sps:$4 sm:$0xff]  }
  0x5c   :  { %1438 = vmatprep.subr.bf16.mxu0 %v1697_v20  ;;  %v1733_v60 = vld [vmem:[#allocation5 + $0x1b0] sm:$0xff]   ;;  %v1322_v61 = vcombine.high %v83_v59, %v83_v59  ;;  %v1734_v62 = vld [vmem:[#allocation5 + $0x178] sm:$0xff]   ;;  %v1321_v1 = vcombine.low %v83_v59, %v83_v59  ;;  %v1740_v3 = vld [vmem:[#allocation7] sm:$0xff]  }
  0x5d   :  { %1459 = vmatpush3.bf16.msra.mxu1 %v1696_v19  ;;  %v1735_v63 = vld [vmem:[#allocation5 + $0x138] sm:$0xff]   ;;  %v1741_v4 = vld [vmem:[#allocation7 + $0x8] sm:$0xff]   ;;  %v1742_v5 = vld [vmem:[#allocation7 + $0x10] sm:$0xff]  }
  0x5e   :  { %1460 = vmatprep.subr.bf16.mxu1 %v1699_v22  ;;  %v1738_v0 = vld [vmem:[#allocation5 + $0x1b8] sm:$0xff]   ;;  %v1744_v7 = vld [vmem:[#allocation7 + $0x20] sm:$0xff]   ;;  %v1745_v8 = vld [vmem:[#allocation7 + $0x28] sm:$0xff]  }
  0x5f   :  { %1439 = vmatpush3.bf16.msra.mxu0 %v1698_v21  ;;  %v1743_v6 = vld [vmem:[#allocation7 + $0x18] sm:$0xff]   ;;  %v1746_v9 = vld [vmem:[#allocation7 + $0x30] sm:$0xff]   ;;  %v1748_v11 = vld [vmem:[#allocation7 + $0x40] sm:$0xff]  }
  0x60   :  { %1440 = vmatprep.subr.bf16.mxu0 %v1701_v24  ;;  %v1747_v10 = vld [vmem:[#allocation7 + $0x38] sm:$0xff]   ;;  %v1749_v12 = vld [vmem:[#allocation7 + $0x48] sm:$0xff]   ;;  %v1750_v13 = vld [vmem:[#allocation7 + $0x50] sm:$0xff]  }
  0x61   :  { %1461 = vmatpush3.bf16.msra.mxu1 %v1700_v23  ;;  %v1751_v14 = vld [vmem:[#allocation7 + $0x58] sm:$0xff]   ;;  %v1752_v15 = vld [vmem:[#allocation7 + $0x60] sm:$0xff]   ;;  %v1753_v16 = vld [vmem:[#allocation7 + $0x68] sm:$0xff]  }
  0x62   :  { %1462 = vmatprep.subr.bf16.mxu1 %v1703_v26  ;;  %v1316_v18 = vld [vmem:[%s2101_s2] ss:$0 sm:$0xff] }
  0x63   :  { %1441 = vmatpush3.bf16.msra.mxu0 %v1702_v25 }
  0x64   :  { %1442 = vmatprep.subr.bf16.mxu0 %v1705_v28 }
  0x65   :  { %1463 = vmatpush3.bf16.msra.mxu1 %v1704_v27 }
  0x66   :  { %1464 = vmatprep.subr.bf16.mxu1 %v1707_v30 }
  0x67   :  { %1443 = vmatpush3.bf16.msra.mxu0 %v1706_v29 }
  0x68   :  { %1472 = vmatprep.subr.bf16.mxu0 %v1711_v35 }
  0x69   :  { %1465 = vmatpush3.bf16.msra.mxu1 %v1710_v34 }
  0x6a   :  { %598 = vmatmul.mubr.bf16.vlgmr.msra.gmra.mrb[0].mxu0 %v1317_v32  ;;  %1548 = vmatprep.subr.bf16.mxu1 %v1904_v42 }
  0x6b   :  { %1473 = vmatpush3.bf16.msra.mxu0 %v1714_v39  ;;  %677 = vmatprep.mubr.bf16.mxu0 %v1322_v61  ;;  %v1763_v61 = vld [vmem:[#allocation7 + $0xb8] sm:$0xff]  }
  0x6c   :  { %638 = vmatmul.mubr.bf16.vlgmr.msra.gmra.mrb[0].mxu1 %v1319_v37  ;;  %1474 = vmatprep.subr.bf16.mxu0 %v1716_v41 }
  0x6d   :  { %1549 = vmatpush3.bf16.msra.mxu1 %v1715_v40  ;;  %1564 = vmatprep.mubr.msk.bf16.mxu1 %vm1905_vm0, %v1904_v42 }
  0x6e   :  { %1550 = vmatprep.subr.bf16.mxu1 %v1904_v42 }
  0x6f   :  { %1475 = vmatpush3.bf16.msra.mxu0 %v1717_v43 }
  0x70   :  { %1476 = vmatprep.subr.bf16.mxu0 %v1719_v45  ;;  %v1755_v45 = vld [vmem:[#allocation7 + $0x78] sm:$0xff]  }
  0x71   :  { %1551 = vmatpush3.bf16.msra.mxu1 %v1718_v44  ;;  %v1754_v44 = vld [vmem:[#allocation7 + $0x70] sm:$0xff]  }
  0x72   :  { %1552 = vmatprep.subr.bf16.mxu1 %v1904_v42 }
  0x73   :  { %1477 = vmatpush3.bf16.msra.mxu0 %v1720_v46  ;;  %v1756_v46 = vld [vmem:[#allocation7 + $0x80] sm:$0xff]  }
  0x74   :  { %1478 = vmatprep.subr.bf16.mxu0 %v1722_v48  ;;  %v1758_v48 = vld [vmem:[#allocation7 + $0x90] sm:$0xff]  }
  0x75   :  { %1553 = vmatpush3.bf16.msra.mxu1 %v1721_v47  ;;  %v1757_v47 = vld [vmem:[#allocation7 + $0x88] sm:$0xff]  }
  0x76   :  { %1554 = vmatprep.subr.bf16.mxu1 %v1904_v42 }
  0x77   :  { %1479 = vmatpush3.bf16.msra.mxu0 %v1723_v49  ;;  %v1759_v49 = vld [vmem:[#allocation7 + $0x98] sm:$0xff]  }
  0x78   :  { %1480 = vmatprep.subr.bf16.mxu0 %v1725_v50  ;;  %v1760_v50 = vld [vmem:[#allocation7 + $0xa0] sm:$0xff]  }
  0x79   :  { %1555 = vmatpush3.bf16.msra.mxu1 %v1724_v51  ;;  %v1761_v51 = vld [vmem:[#allocation7 + $0xa8] sm:$0xff]  }
  0x7a   :  { %1556 = vmatprep.subr.bf16.mxu1 %v1904_v42 }
  0x7b   :  { %1481 = vmatpush3.bf16.msra.mxu0 %v1726_v52  ;;  %v1380_v52 = vld [vmem:[%s2103_s4] ss:$0 sm:$0xff] }
  0x7c   :  { %1482 = vmatprep.subr.bf16.mxu0 %v1728_v53 }
  0x7d   :  { %1557 = vmatpush3.bf16.msra.mxu1 %v1727_v54 }
  0x7e   :  { %1558 = vmatprep.subr.bf16.mxu1 %v1904_v42 }
  0x7f   :  { %1483 = vmatpush3.bf16.msra.mxu0 %v1729_v55 }
  0x80   :  { %1484 = vmatprep.subr.bf16.mxu0 %v1731_v56 }
  0x81   :  { %1559 = vmatpush3.bf16.msra.mxu1 %v1730_v57 }
  0x82   :  { %1560 = vmatprep.subr.bf16.mxu1 %v1904_v42 }
  0x83   :  { %1485 = vmatpush3.bf16.msra.mxu0 %v1732_v58 }
  0x84   :  { %1486 = vmatprep.subr.bf16.mxu0 %v1734_v62  ;;  %v1764_v62 = vld [vmem:[#allocation7 + $0xc0] sm:$0xff]  }
  0x85   :  { %1561 = vmatpush3.bf16.msra.mxu1 %v1733_v60  ;;  %v1762_v60 = vld [vmem:[#allocation7 + $0xb0] sm:$0xff]  }
  0x86   :  { %1562 = vmatprep.subr.bf16.mxu1 %v1904_v42 }
  0x87   :  { %1487 = vmatpush3.bf16.msra.mxu0 %v1735_v63  ;;  %v1765_v63 = vld [vmem:[#allocation7 + $0xc8] sm:$0xff]  }
  0x88   :  { %1568 = vmatprep.subr.bf16.mxu0 %v1904_v42 }
  0x89   :  { %1563 = vmatpush3.bf16.msra.mxu1 %v1738_v0  ;;  %v1766_v0 = vld [vmem:[#allocation7 + $0xd0] sm:$0xff]  }
  0x8a   :  { %678 = vmatmul.mubr.bf16.vlgmr.msra.gmra.mrb[4].mxu0 %v1321_v1  ;;  %1588 = vmatprep.subr.bf16.mxu1 %v1904_v42  ;;  %v1767_v1 = vld [vmem:[#allocation7 + $0xd8] sm:$0xff]  }
  0x8b   :  { %1584 = vmatprep.mubr.msk.bf16.mxu0 %vm1905_vm0, %v1904_v42  ;;  %1569 = vmatpush3.bf16.msra.mxu0 %v1740_v3  ;;  %v1769_v3 = vld [vmem:[#allocation7 + $0xe8] sm:$0xff]  }
  0x8c   :  { %1565 = vmatmul.mubr.bf16.vlgmr.msra.gmra.mrb[4].mxu1 %v1739_v2  ;;  %1570 = vmatprep.subr.bf16.mxu0 %v1904_v42  ;;  %v1768_v2 = vld [vmem:[#allocation7 + $0xe0] sm:$0xff]  }
  0x8d   :  { %1604 = vmatprep.mubr.msk.bf16.mxu1 %vm1905_vm0, %v1904_v42  ;;  %1589 = vmatpush3.bf16.msra.mxu1 %v1748_v11 }
  0x8e   :  { %1590 = vmatprep.subr.bf16.mxu1 %v1904_v42 }
  0x8f   :  { %1571 = vmatpush3.bf16.msra.mxu0 %v1741_v4  ;;  %v1390_v4 = vld [vmem:[%s2103_s4 + $0x1] ss:$0 sm:$0xff] }
  0x90   :  { %1572 = vmatprep.subr.bf16.mxu0 %v1904_v42 }
  0x91   :  { %1591 = vmatpush3.bf16.msra.mxu1 %v1749_v12 }
  0x92   :  { %1592 = vmatprep.subr.bf16.mxu1 %v1904_v42 }
  0x93   :  { %1573 = vmatpush3.bf16.msra.mxu0 %v1742_v5 }
  0x94   :  { %1574 = vmatprep.subr.bf16.mxu0 %v1904_v42 }
  0x95   :  { %1593 = vmatpush3.bf16.msra.mxu1 %v1750_v13  ;;  %v1770_v13 = vld [vmem:[#allocation7 + $0xf0] sm:$0xff]  }
  0x96   :  { %1594 = vmatprep.subr.bf16.mxu1 %v1904_v42 }
  0x97   :  { %1575 = vmatpush3.bf16.msra.mxu0 %v1743_v6 }
  0x98   :  { %1576 = vmatprep.subr.bf16.mxu0 %v1904_v42 }
  0x99   :  { %1595 = vmatpush3.bf16.msra.mxu1 %v1751_v14  ;;  %v1771_v14 = vld [vmem:[#allocation7 + $0xf8] sm:$0xff]  }
  0x9a   :  { %1596 = vmatprep.subr.bf16.mxu1 %v1904_v42 }
  0x9b   :  { %1577 = vmatpush3.bf16.msra.mxu0 %v1744_v7 }
  0x9c   :  { %1578 = vmatprep.subr.bf16.mxu0 %v1904_v42 }
  0x9d   :  { %1597 = vmatpush3.bf16.msra.mxu1 %v1752_v15  ;;  %v1772_v15 = vld [vmem:[#allocation8] sm:$0xff]  }
  0x9e   :  { %1598 = vmatprep.subr.bf16.mxu1 %v1904_v42 }
  0x9f   :  { %1579 = vmatpush3.bf16.msra.mxu0 %v1745_v8 }
  0xa0   :  { %1580 = vmatprep.subr.bf16.mxu0 %v1904_v42 }
  0xa1   :  { %1599 = vmatpush3.bf16.msra.mxu1 %v1753_v16  ;;  %v1773_v16 = vld [vmem:[#allocation8 + $0x8] sm:$0xff]  }
  0xa2   :  { %1600 = vmatprep.subr.bf16.mxu1 %v1904_v42 }
  0xa3   :  { %1581 = vmatpush3.bf16.msra.mxu0 %v1746_v9 }
  0xa4   :  { %1582 = vmatprep.subr.bf16.mxu0 %v1904_v42 }
  0xa5   :  { %1601 = vmatpush3.bf16.msra.mxu1 %v1754_v44 }
  0xa6   :  { %1602 = vmatprep.subr.bf16.mxu1 %v1904_v42 }
  0xa7   :  { %1583 = vmatpush3.bf16.msra.mxu0 %v1747_v10 }
  0xa8   :  { %1608 = vmatprep.subr.bf16.mxu0 %v1904_v42 }
  0xa9   :  { %1603 = vmatpush3.bf16.msra.mxu1 %v1755_v45 }
  0xaa   :  { %1628 = vmatprep.subr.bf16.mxu1 %v1904_v42 }
 0x13d   :  { %v1444_v17 = vpop.f32.mrb[0].mxu0 }
 0x13e   :  { %v1445_v19 = vpop.f32.mrb[1].mxu0 }
 0x13f   :  { %v1446_v20 = vadd.f32 %v1445_v19, %v1444_v17  ;;  %v1447_v21 = vpop.f32.mrb[2].mxu0  ;;  %v1466_v22 = vpop.f32.mrb[0].mxu1  ;;  %v1774_v17 = vld [vmem:[#allocation8 + $0x10] sm:$0xff]   ;;  %v1776_v19 = vld [vmem:[#allocation8 + $0x20] sm:$0xff]  }
 0x140   :  { %v1448_v23 = vpop.f32.mrb[3].mxu0  ;;  %v1467_v24 = vpop.f32.mrb[1].mxu1  ;;  %v1400_v21 = vld [vmem:[%s2103_s4 + $0x2] ss:$0 sm:$0xff] }
 0x141   :  { %v600_v25 = vadd.f32 %v1446_v20, %v1316_v18  ;;  %v1468_v26 = vadd.f32 %v1467_v24, %v1466_v22  ;;  %v1469_v27 = vpop.f32.mrb[2].mxu1  ;;  %v1775_v18 = vld [vmem:[#allocation8 + $0x18] sm:$0xff]   ;;  %v1777_v20 = vld [vmem:[#allocation8 + $0x28] sm:$0xff]  }
 0x142   :  { %v1470_v28 = vpop.f32.mrb[3].mxu1 }
 0x143   :  { %v640_v29 = vadd.f32 %v1468_v26, %v600_v25 }
 0x15d   :  { %v1488_v30 = vpop.f32.mrb[4].mxu0 }
 0x15e   :  { %v1489_v31 = vpop.f32.mrb[5].mxu0 }
 0x15f   :  { %v1490_v32 = vadd.f32 %v1489_v31, %v1488_v30  ;;  %v1491_v33 = vpop.f32.mrb[6].mxu0  ;;  %v719_v34 = vpop.f32.mrb[4].mxu1  ;;  %v1779_v30 = vld [vmem:[#allocation8 + $0x38] sm:$0xff]   ;;  %v1410_v31 = vld [vmem:[%s2103_s4 + $0x3] ss:$0 sm:$0xff]  ;;  %s1868_s4 = scalar_lea.vmem %s1306_s14, 128 }
 0x160   :  { %v1492_v35 = vpop.f32.mrb[7].mxu0  ;;  %v1566_v36 = vpop.f32.mrb[5].mxu1  ;;  %p1869_p4 = scmp.ne.s32.totalorder %s1306_s14, %s1868_s4  ;;  %p1874_p6 = scmp.lt.s32.totalorder %s1868_s4, %s1868_s4 }
 0x161   :  { %v680_v37 = vadd.f32 %v1490_v32, %v640_v29  ;;  %v722_v38 = vpop.f32.mrb[6].mxu1  ;;  %v1778_v29 = vld [vmem:[#allocation8 + $0x30] sm:$0xff]  }
 0x162   :  { %v1567_v39 = vpop.f32.mrb[7].mxu1  ;;  %p1875_p7 = por %p1874_p6, %p1873_p5 }
 0x163   :  { %v720_v40 = vadd.f32 %v719_v34, %v680_v37 }
 0x164   :  { %p1876_p8 = pnand %p1875_p7, %p1869_p4 }
 0x165   :  { %v2037_v41 = vmax.f32 %v720_v40, 0.0  ;;  %v1419_v40 = vld [vmem:[%s2105_s6] ss:$0 sm:$0xff] }
 0x167   :  { %v726_v43 = vpack.c.bf16 %v2037_v41, %v2037_v41 }
 0x169   :  { %1585 = vmatmul.mubr.bf16.vlgmr.msra.gmra.mrb[8].mxu0 %v726_v43 }
 0x16a   :  { %1624 = vmatprep.mubr.msk.bf16.mxu0 %vm1905_vm0, %v1904_v42  ;;  %1609 = vmatpush3.bf16.msra.mxu0 %v1756_v46 }
 0x16b   :  { %1610 = vmatprep.subr.bf16.mxu0 %v1904_v42 }
 0x16e   :  { %1611 = vmatpush3.bf16.msra.mxu0 %v1757_v47 }
 0x16f   :  { %1612 = vmatprep.subr.bf16.mxu0 %v1904_v42 }
 0x172   :  { %1613 = vmatpush3.bf16.msra.mxu0 %v1758_v48 }
 0x173   :  { %1614 = vmatprep.subr.bf16.mxu0 %v1904_v42 }
 0x176   :  { %1615 = vmatpush3.bf16.msra.mxu0 %v1759_v49 }
 0x177   :  { %1616 = vmatprep.subr.bf16.mxu0 %v1904_v42 }
 0x17a   :  { %1617 = vmatpush3.bf16.msra.mxu0 %v1760_v50 }
 0x17b   :  { %1618 = vmatprep.subr.bf16.mxu0 %v1904_v42 }
 0x17e   :  { %1619 = vmatpush3.bf16.msra.mxu0 %v1761_v51 }
 0x17f   :  { %1620 = vmatprep.subr.bf16.mxu0 %v1904_v42 }
 0x182   :  { %1621 = vmatpush3.bf16.msra.mxu0 %v1762_v60 }
 0x183   :  { %1622 = vmatprep.subr.bf16.mxu0 %v1904_v42 }
 0x186   :  { %1623 = vmatpush3.bf16.msra.mxu0 %v1763_v61 }
 0x187   :  { %1648 = vmatprep.subr.bf16.mxu0 %v1904_v42 }
 0x23c   :  { %v832_v53 = vpop.f32.mrb[8].mxu0 }
 0x23d   :  { %v833_v54 = vadd.f32 %v1380_v52, %v832_v53  ;;  %v1586_v55 = vpop.f32.mrb[9].mxu0 }
 0x23e   :  { %v835_v56 = vpop.f32.mrb[10].mxu0 }
 0x23f   :  { %v838_v57 = vmax.f32 %v833_v54, 0.0  ;;  %v1587_v58 = vpop.f32.mrb[11].mxu0 }
 0x241   :  { %v839_v59 = vpack.c.bf16 %v838_v57, %v838_v57 }
 0x243   :  { %1605 = vmatmul.mubr.bf16.vlgmr.msra.gmra.mrb[8].mxu1 %v839_v59 }
 0x244   :  { %1644 = vmatprep.mubr.msk.bf16.mxu1 %vm1905_vm0, %v1904_v42  ;;  %1629 = vmatpush3.bf16.msra.mxu1 %v1764_v62 }
 0x245   :  { %1630 = vmatprep.subr.bf16.mxu1 %v1904_v42 }
 0x248   :  { %1631 = vmatpush3.bf16.msra.mxu1 %v1765_v63 }
 0x249   :  { %1632 = vmatprep.subr.bf16.mxu1 %v1904_v42 }
 0x24c   :  { %1633 = vmatpush3.bf16.msra.mxu1 %v1766_v0 }
 0x24d   :  { %1634 = vmatprep.subr.bf16.mxu1 %v1904_v42 }
 0x250   :  { %1635 = vmatpush3.bf16.msra.mxu1 %v1767_v1 }
 0x251   :  { %1636 = vmatprep.subr.bf16.mxu1 %v1904_v42 }
 0x254   :  { %1637 = vmatpush3.bf16.msra.mxu1 %v1768_v2 }
 0x255   :  { %1638 = vmatprep.subr.bf16.mxu1 %v1904_v42 }
 0x258   :  { %1639 = vmatpush3.bf16.msra.mxu1 %v1769_v3 }
 0x259   :  { %1640 = vmatprep.subr.bf16.mxu1 %v1904_v42 }
 0x25c   :  { %1641 = vmatpush3.bf16.msra.mxu1 %v1770_v13 }
 0x25d   :  { %1642 = vmatprep.subr.bf16.mxu1 %v1904_v42 }
 0x260   :  { %1643 = vmatpush3.bf16.msra.mxu1 %v1771_v14 }
 0x316   :  { %v947_v5 = vpop.f32.mrb[8].mxu1 }
 0x317   :  { %v948_v6 = vadd.f32 %v1390_v4, %v947_v5  ;;  %v1606_v7 = vpop.f32.mrb[9].mxu1 }
 0x318   :  { %v950_v8 = vpop.f32.mrb[10].mxu1 }
 0x319   :  { %v953_v9 = vadd.f32 %v948_v6, %v2037_v41  ;;  %v1607_v10 = vpop.f32.mrb[11].mxu1 }
 0x31b   :  { %v954_v11 = vmax.f32 %v953_v9, 0.0 }
 0x31d   :  { %v955_v12 = vpack.c.bf16 %v954_v11, %v954_v11 }
 0x31f   :  { %1625 = vmatmul.mubr.bf16.vlgmr.msra.gmra.mrb[12].mxu0 %v955_v12 }
 0x320   :  { %1664 = vmatprep.mubr.msk.bf16.mxu0 %vm1905_vm0, %v1904_v42  ;;  %1649 = vmatpush3.bf16.msra.mxu0 %v1772_v15 }
 0x321   :  { %1650 = vmatprep.subr.bf16.mxu0 %v1904_v42 }
 0x324   :  { %1651 = vmatpush3.bf16.msra.mxu0 %v1773_v16 }
 0x325   :  { %1652 = vmatprep.subr.bf16.mxu0 %v1904_v42 }
 0x328   :  { %1653 = vmatpush3.bf16.msra.mxu0 %v1774_v17 }
 0x329   :  { %1654 = vmatprep.subr.bf16.mxu0 %v1904_v42 }
 0x32c   :  { %1655 = vmatpush3.bf16.msra.mxu0 %v1775_v18 }
 0x32d   :  { %1656 = vmatprep.subr.bf16.mxu0 %v1904_v42 }
 0x330   :  { %1657 = vmatpush3.bf16.msra.mxu0 %v1776_v19 }
 0x331   :  { %1658 = vmatprep.subr.bf16.mxu0 %v1904_v42 }
 0x334   :  { %1659 = vmatpush3.bf16.msra.mxu0 %v1777_v20 }
 0x335   :  { %1660 = vmatprep.subr.bf16.mxu0 %v1904_v42 }
 0x338   :  { %1661 = vmatpush3.bf16.msra.mxu0 %v1778_v29 }
 0x339   :  { %1662 = vmatprep.subr.bf16.mxu0 %v1904_v42 }
 0x33c   :  { %1663 = vmatpush3.bf16.msra.mxu0 %v1779_v30 }
 0x3f2   :  { %v1063_v22 = vpop.f32.mrb[12].mxu0 }
 0x3f3   :  { %v1064_v23 = vadd.f32 %v1400_v21, %v1063_v22  ;;  %v1626_v24 = vpop.f32.mrb[13].mxu0 }
 0x3f4   :  { %v1066_v25 = vpop.f32.mrb[14].mxu0 }
 0x3f5   :  { %v1069_v26 = vmax.f32 %v1064_v23, 0.0  ;;  %v1627_v27 = vpop.f32.mrb[15].mxu0 }
 0x3f7   :  { %v1070_v28 = vpack.c.bf16 %v1069_v26, %v1069_v26 }
 0x3f9   :  { %1645 = vmatmul.mubr.bf16.vlgmr.msra.gmra.mrb[12].mxu1 %v1070_v28 }
 0x4cc   :  { %v1178_v32 = vpop.f32.mrb[12].mxu1 }
 0x4cd   :  { %v1179_v33 = vadd.f32 %v1410_v31, %v1178_v32  ;;  %v1646_v34 = vpop.f32.mrb[13].mxu1 }
 0x4ce   :  { %v1181_v35 = vpop.f32.mrb[14].mxu1 }
 0x4cf   :  { %v1184_v36 = vadd.f32 %v1179_v33, %v954_v11  ;;  %v1647_v37 = vpop.f32.mrb[15].mxu1 }
 0x4d1   :  { %v1185_v38 = vmax.f32 %v1184_v36, 0.0 }
 0x4d3   :  { %v1186_v39 = vpack.c.bf16 %v1185_v38, %v1185_v38 }
 0x4d5   :  { %1665 = vmatmul.mubr.bf16.vlgmr.msra.gmra.mrb[16].mxu0 %v1186_v39 }
 0x5a8   :  { %v1292_v42 = vpop.f32.mrb[16].mxu0 }
 0x5a9   :  { %v1293_v41 = vadd.f32 %v1419_v40, %v1292_v42  ;;  %v1666_v43 = vpop.f32.mrb[17].mxu0 }
 0x5aa   :  { %v1295_v44 = vpop.f32.mrb[18].mxu0 }
 0x5ab   :  { %1298 = vst [vmem:[#allocation10] sm:$0xff] %v1293_v41  ;;  %v1667_v45 = vpop.f32.mrb[19].mxu0 }
 0x5ac   :  { %1879 = shalt.err (!%p1876_p8)
}
 0x5ad   :  { %s1880_s6 = scalar_lea.hbm %s2106_s7, 128 }
 0x5ae   :  { %p1881_p9 = scmp.ne.s32.totalorder %s2106_s7, %s1880_s6  ;;  %p1884_p10 = scmp.lt.u32.totalorder %s1880_s6, %s2106_s7 }
 0x5b0   :  { %p1886_p11 = pnand %p1884_p10, %p1881_p9 }
 0x5b2   :  { %1889 = shalt.err (!%p1886_p11)
}
 0x5b3   :  { %1308 = dma.vmem_to_hbm [thread:$0]  %s1306_s14, 128, %s2106_s7, [#allocation4]  }
 0x5b4   :  { %1896 = dma.done.wait [#allocation4], 128  }
 0x5b5   :  { %1897 = vsyncadd [#allocation4], 4294967168 }
 0x5b6   :  { %1312 = vsyncpa [#allocation3], 1 }
 0x5b7   :  { %1313 = vsyncpa [#allocation6], 1 }
 0x5b8   :  { %1314 = vsyncpa [#allocation9], 1 }
 0x5b9   :  { %1315 = vsyncpa [#allocation4], 1 }

</bundles_post_ra>
